<compile_context>
chip_gen: v7x
topology: tpu7x:2x2x1
jax: 0.10.0
libtpu: 0.0.40
codegen_flags: <defaults>
</compile_context>

<pallas_src>
import numpy as np
import jax
import jax.numpy as jnp
from jax.experimental import pallas as pl
from jax.experimental.pallas import tpu as pltpu

HIDDEN = 512
LANE = 128


def _round_up(n: int, m: int) -> int:
    return ((n + m - 1) // m) * m


def _pick_tile_b(B: int) -> int:
    # MXU-sized M tile for large batches; small batches padded to a multiple of 16.
    if B >= 128:
        return 128
    return min(128, _round_up(B, 16))


def _discriminator_kernel(x_ref, w1_ref, b1_ref, w2_ref, b2_ref, w3_ref, b3_ref,
                          out_ref):
    # Linear 1 + ReLU (Dropout == identity in eval mode)
    h1 = jnp.dot(x_ref[...], w1_ref[...], preferred_element_type=jnp.float32)
    h1 = jnp.maximum(h1 + b1_ref[...], 0.0).astype(jnp.bfloat16)
    # Linear 2 + ReLU
    h2 = jnp.dot(h1, w2_ref[...], preferred_element_type=jnp.float32)
    h2 = jnp.maximum(h2 + b2_ref[...], 0.0).astype(jnp.bfloat16)
    # Linear 3 -> lane-dense (TILE_B, N_pad); split/sigmoid done in the wrapper.
    out = jnp.dot(h2, w3_ref[...], preferred_element_type=jnp.float32)
    out_ref[...] = out + b3_ref[...]


def discriminator_forward(x, params):
    """x: (B, in_features) float32. params: dict of w1,b1,w2,b2,w3,b3 (float32)."""
    B, in_features = x.shape
    n_out = 1 + in_features

    tile_b = _pick_tile_b(B)
    b_pad = _round_up(B, tile_b)
    k_pad = _round_up(in_features, LANE)
    n_pad = _round_up(n_out, LANE)
    grid = (b_pad // tile_b,)

    # --- prepare lane-dense, bf16 operands (zero padding is mathematically inert) ---
    x_p = jnp.zeros((b_pad, k_pad), jnp.bfloat16).at[:B, :in_features].set(
        x.astype(jnp.bfloat16))
    w1 = jnp.zeros((k_pad, HIDDEN), jnp.bfloat16).at[:in_features, :].set(
        params["w1"].astype(jnp.bfloat16))
    w2 = params["w2"].astype(jnp.bfloat16)
    w3 = jnp.zeros((HIDDEN, n_pad), jnp.bfloat16).at[:, :n_out].set(
        params["w3"].astype(jnp.bfloat16))
    b1 = params["b1"]
    b2 = params["b2"]
    b3 = jnp.zeros((1, n_pad), jnp.float32).at[:, :n_out].set(params["b3"])

    x_spec = pl.BlockSpec((tile_b, k_pad), lambda i: (i, 0))
    # Weights / biases: constant block index -> VMEM-resident across grid steps.
    w1_spec = pl.BlockSpec((k_pad, HIDDEN), lambda i: (0, 0))
    b1_spec = pl.BlockSpec((1, HIDDEN), lambda i: (0, 0))
    w2_spec = pl.BlockSpec((HIDDEN, HIDDEN), lambda i: (0, 0))
    b2_spec = pl.BlockSpec((1, HIDDEN), lambda i: (0, 0))
    w3_spec = pl.BlockSpec((HIDDEN, n_pad), lambda i: (0, 0))
    b3_spec = pl.BlockSpec((1, n_pad), lambda i: (0, 0))
    out_spec = pl.BlockSpec((tile_b, n_pad), lambda i: (i, 0))

    out_pad = pl.pallas_call(
        _discriminator_kernel,
        grid=grid,
        in_specs=[x_spec, w1_spec, b1_spec, w2_spec, b2_spec, w3_spec, b3_spec],
        out_specs=out_spec,
        out_shape=jax.ShapeDtypeStruct((b_pad, n_pad), jnp.float32),
        compiler_params=pltpu.CompilerParams(
            dimension_semantics=("parallel",)),
    )(x_p, w1, b1, w2, b2, w3, b3)

    # Wrapper-side split (free layout plumbing in XLA).
    out = out_pad[:B, :n_out]
    fake_cls = jax.nn.sigmoid(out[:, in_features:in_features + 1])
    closest_sample = out[:, :in_features]
    return fake_cls, closest_sample


def init_params(key, in_features: int):
    """Deterministic init mimicking torch.nn.Linear default uniform init."""
    keys = jax.random.split(key, 6)

    def linear(kw, kb, fan_in, fan_out):
        bound = 1.0 / np.sqrt(fan_in)
        w = jax.random.uniform(kw, (fan_in, fan_out), jnp.float32, -bound, bound)
        b = jax.random.uniform(kb, (1, fan_out), jnp.float32, -bound, bound)
        return w, b

    w1, b1 = linear(keys[0], keys[1], in_features, HIDDEN)
    w2, b2 = linear(keys[2], keys[3], HIDDEN, HIDDEN)
    w3, b3 = linear(keys[4], keys[5], HIDDEN, 1 + in_features)
    return dict(w1=w1, b1=b1, w2=w2, b2=b2, w3=w3, b3=b3)


def reference_forward(x, p):
    """Pure-JAX reference with the same bf16 weight / activation precision."""
    xb = x.astype(jnp.bfloat16)
    w1 = p["w1"].astype(jnp.bfloat16)
    w2 = p["w2"].astype(jnp.bfloat16)
    w3 = p["w3"].astype(jnp.bfloat16)
    h1 = jnp.maximum(jnp.dot(xb, w1, preferred_element_type=jnp.float32)
                     + p["b1"], 0.0).astype(jnp.bfloat16)
    h2 = jnp.maximum(jnp.dot(h1, w2, preferred_element_type=jnp.float32)
                     + p["b2"], 0.0).astype(jnp.bfloat16)
    out = jnp.dot(h2, w3, preferred_element_type=jnp.float32) + p["b3"]
    return jax.nn.sigmoid(out[:, -1:]), out[:, :-1]


if __name__ == "__main__":
    B = 2
    in_features = 32

    key = jax.random.PRNGKey(0)
    k_x, k_p = jax.random.split(key)
    x = jax.random.normal(k_x, (B, in_features), jnp.float32)
    params = init_params(k_p, in_features)

    fwd = jax.jit(discriminator_forward)
    fake_cls, closest_sample = fwd(x, params)
    jax.block_until_ready((fake_cls, closest_sample))

    ref_fake, ref_closest = reference_forward(x, params)
    assert fake_cls.shape == (B, 1)
    assert closest_sample.shape == (B, in_features)
    np.testing.assert_allclose(np.asarray(fake_cls), np.asarray(ref_fake),
                               rtol=1e-3, atol=1e-3)
    np.testing.assert_allclose(np.asarray(closest_sample), np.asarray(ref_closest),
                               rtol=1e-3, atol=1e-3)

    print("KERNEL_OK")
</pallas_src>

<mosaic_0001>
module attributes {stable_mosaic.version = 11 : i64} {
  func.func @_discriminator_kernel(%arg0: i32, %arg1: memref<16x128xbf16, #tpu.memory_space<vmem>>, %arg2: memref<128x512xbf16, #tpu.memory_space<vmem>>, %arg3: memref<1x512xf32, #tpu.memory_space<vmem>>, %arg4: memref<512x512xbf16, #tpu.memory_space<vmem>>, %arg5: memref<1x512xf32, #tpu.memory_space<vmem>>, %arg6: memref<512x128xbf16, #tpu.memory_space<vmem>>, %arg7: memref<1x128xf32, #tpu.memory_space<vmem>>, %arg8: memref<16x128xf32, #tpu.memory_space<vmem>>) attributes {dimension_semantics = [#tpu.dimension_semantics<parallel>], iteration_bounds = array<i64: 1>, scalar_prefetch = 0 : i64, scratch_operands = 0 : i64, tpu.core_type = #tpu.core_type<tc>, window_params = [{transform_indices = @transform_0, window_bounds = array<i64: 16, 128>}, {pipeline_mode = #tpu.pipeline_mode<synchronous>, transform_indices = @transform_1, window_bounds = array<i64: 128, 512>}, {pipeline_mode = #tpu.pipeline_mode<synchronous>, transform_indices = @transform_2, window_bounds = array<i64: 1, 512>}, {pipeline_mode = #tpu.pipeline_mode<synchronous>, transform_indices = @transform_3, window_bounds = array<i64: 512, 512>}, {pipeline_mode = #tpu.pipeline_mode<synchronous>, transform_indices = @transform_4, window_bounds = array<i64: 1, 512>}, {pipeline_mode = #tpu.pipeline_mode<synchronous>, transform_indices = @transform_5, window_bounds = array<i64: 512, 128>}, {pipeline_mode = #tpu.pipeline_mode<synchronous>, transform_indices = @transform_6, window_bounds = array<i64: 1, 128>}, {transform_indices = @transform_7, window_bounds = array<i64: 16, 128>}]} {
    %c0 = arith.constant 0 : index
    %c0_0 = arith.constant 0 : index
    %0 = vector.load %arg1[%c0, %c0_0] : memref<16x128xbf16, #tpu.memory_space<vmem>>, vector<16x128xbf16>
    %c0_1 = arith.constant 0 : index
    %c0_2 = arith.constant 0 : index
    %1 = vector.load %arg2[%c0_1, %c0_2] : memref<128x512xbf16, #tpu.memory_space<vmem>>, vector<128x512xbf16>
    %cst = arith.constant dense<0.000000e+00> : vector<16x512xf32>
    %2 = tpu.matmul %0, %1, %cst {dimension_numbers = #tpu.dot_dimension_numbers<[1], [0], [0], [1], [0, 0, 1, 1], [], []>} : vector<16x128xbf16>, vector<128x512xbf16>, vector<16x512xf32> -> vector<16x512xf32>
    %c0_3 = arith.constant 0 : index
    %c0_4 = arith.constant 0 : index
    %3 = vector.load %arg3[%c0_3, %c0_4] : memref<1x512xf32, #tpu.memory_space<vmem>>, vector<1x512xf32>
    %4 = vector.broadcast %3 : vector<1x512xf32> to vector<16x512xf32>
    %5 = arith.addf %2, %4 : vector<16x512xf32>
    %cst_5 = arith.constant 0.000000e+00 : f32
    %6 = vector.broadcast %cst_5 : f32 to vector<16x512xf32>
    %7 = arith.maximumf %5, %6 : vector<16x512xf32>
    %8 = arith.truncf %7 : vector<16x512xf32> to vector<16x512xbf16>
    %c0_6 = arith.constant 0 : index
    %c0_7 = arith.constant 0 : index
    %9 = vector.load %arg4[%c0_6, %c0_7] : memref<512x512xbf16, #tpu.memory_space<vmem>>, vector<512x512xbf16>
    %cst_8 = arith.constant dense<0.000000e+00> : vector<16x512xf32>
    %10 = tpu.matmul %8, %9, %cst_8 {dimension_numbers = #tpu.dot_dimension_numbers<[1], [0], [0], [1], [0, 0, 1, 1], [], []>} : vector<16x512xbf16>, vector<512x512xbf16>, vector<16x512xf32> -> vector<16x512xf32>
    %c0_9 = arith.constant 0 : index
    %c0_10 = arith.constant 0 : index
    %11 = vector.load %arg5[%c0_9, %c0_10] : memref<1x512xf32, #tpu.memory_space<vmem>>, vector<1x512xf32>
    %12 = vector.broadcast %11 : vector<1x512xf32> to vector<16x512xf32>
    %13 = arith.addf %10, %12 : vector<16x512xf32>
    %cst_11 = arith.constant 0.000000e+00 : f32
    %14 = vector.broadcast %cst_11 : f32 to vector<16x512xf32>
    %15 = arith.maximumf %13, %14 : vector<16x512xf32>
    %16 = arith.truncf %15 : vector<16x512xf32> to vector<16x512xbf16>
    %c0_12 = arith.constant 0 : index
    %c0_13 = arith.constant 0 : index
    %17 = vector.load %arg6[%c0_12, %c0_13] : memref<512x128xbf16, #tpu.memory_space<vmem>>, vector<512x128xbf16>
    %cst_14 = arith.constant dense<0.000000e+00> : vector<16x128xf32>
    %18 = tpu.matmul %16, %17, %cst_14 {dimension_numbers = #tpu.dot_dimension_numbers<[1], [0], [0], [1], [0, 0, 1, 1], [], []>} : vector<16x512xbf16>, vector<512x128xbf16>, vector<16x128xf32> -> vector<16x128xf32>
    %c0_15 = arith.constant 0 : index
    %c0_16 = arith.constant 0 : index
    %19 = vector.load %arg7[%c0_15, %c0_16] : memref<1x128xf32, #tpu.memory_space<vmem>>, vector<1x128xf32>
    %20 = vector.broadcast %19 : vector<1x128xf32> to vector<16x128xf32>
    %21 = arith.addf %18, %20 : vector<16x128xf32>
    %c0_17 = arith.constant 0 : index
    %c0_18 = arith.constant 0 : index
    %22 = vector.load %arg8[%c0_17, %c0_18] : memref<16x128xf32, #tpu.memory_space<vmem>>, vector<16x128xf32>
    tpu.vector_store %arg8[%c0_17, %c0_18], %21 {strides = array<i32>} : memref<16x128xf32, #tpu.memory_space<vmem>>, vector<16x128xf32>,
    return
  }
  func.func @transform_0(%arg0: i32) -> (i32, i32) {
    %c0_i32 = arith.constant 0 : i32
    %c0_i32_0 = arith.constant 0 : i32
    return %arg0, %c0_i32 : i32, i32
  }
  func.func @transform_1(%arg0: i32) -> (i32, i32) {
    %c0_i32 = arith.constant 0 : i32
    %c0_i32_0 = arith.constant 0 : i32
    %c0_i32_1 = arith.constant 0 : i32
    return %c0_i32, %c0_i32_0 : i32, i32
  }
  func.func @transform_2(%arg0: i32) -> (i32, i32) {
    %c0_i32 = arith.constant 0 : i32
    %c0_i32_0 = arith.constant 0 : i32
    %c0_i32_1 = arith.constant 0 : i32
    return %c0_i32, %c0_i32_0 : i32, i32
  }
  func.func @transform_3(%arg0: i32) -> (i32, i32) {
    %c0_i32 = arith.constant 0 : i32
    %c0_i32_0 = arith.constant 0 : i32
    %c0_i32_1 = arith.constant 0 : i32
    return %c0_i32, %c0_i32_0 : i32, i32
  }
  func.func @transform_4(%arg0: i32) -> (i32, i32) {
    %c0_i32 = arith.constant 0 : i32
    %c0_i32_0 = arith.constant 0 : i32
    %c0_i32_1 = arith.constant 0 : i32
    return %c0_i32, %c0_i32_0 : i32, i32
  }
  func.func @transform_5(%arg0: i32) -> (i32, i32) {
    %c0_i32 = arith.constant 0 : i32
    %c0_i32_0 = arith.constant 0 : i32
    %c0_i32_1 = arith.constant 0 : i32
    return %c0_i32, %c0_i32_0 : i32, i32
  }
  func.func @transform_6(%arg0: i32) -> (i32, i32) {
    %c0_i32 = arith.constant 0 : i32
    %c0_i32_0 = arith.constant 0 : i32
    %c0_i32_1 = arith.constant 0 : i32
    return %c0_i32, %c0_i32_0 : i32, i32
  }
  func.func @transform_7(%arg0: i32) -> (i32, i32) {
    %c0_i32 = arith.constant 0 : i32
    %c0_i32_0 = arith.constant 0 : i32
    return %arg0, %c0_i32 : i32, i32
  }
}

</mosaic_0001>

<bundles_post_ra>
// kernel: discriminator_forward.1
= control target key start
LH: loop header
LB: loop body
LE: loop exit
PB: predicated region body
PF: predicated region fallthrough
CT: control target
= control target key end

     0   :  { %v2200_v1 = vmov 0   ;;  %s2861_s1 = inlined_call_operand.vmem [shape: bf16[128,512], index: 1, kind: input, shape index: {}]   ;;  %s2862_s0 = inlined_call_operand.vmem [shape: bf16[16,128], index: 0, kind: input, shape index: {}]   ;;  %s2863_s3 = inlined_call_operand.vmem [shape: bf16[512,512], index: 3, kind: input, shape index: {}]   ;;  %s2864_s5 = inlined_call_operand.vmem [shape: bf16[512,128], index: 5, kind: input, shape index: {}]   ;;  %s2865_s2 = inlined_call_operand.vmem [shape: f32[1,512], index: 2, kind: input, shape index: {}]   ;;  %s2866_s4 = inlined_call_operand.vmem [shape: f32[1,512], index: 4, kind: input, shape index: {}]   ;;  %s2867_s6 = inlined_call_operand.vmem [shape: f32[1,128], index: 6, kind: input, shape index: {}]   ;;  %s2868_s7 = inlined_call_operand.vmem [shape: f32[16,128], index: 7, kind: output, shape index: {}]  }
   0x1   :  { %v1927_v0 = vld [vmem:[%s2861_s1 + $0x4] ss:$16 sps:$4 sm:$0xff]   ;;  %281 = vmatprep.mubr.bf16.mxu0 %v2200_v1  ;;  %324 = vmatprep.mubr.bf16.mxu1 %v2200_v1  ;;  %v1929_v2 = vld [vmem:[%s2861_s1] ss:$16 sps:$4 sm:$0xff]   ;;  %v1952_v10 = vld [vmem:[%s2861_s1 + $0xc] ss:$16 sps:$4 sm:$0xff]  }
   0x2   :  { %249 = vmatprep.subr.bf16.mxu0 %v1927_v0  ;;  %v1930_v3 = vld [vmem:[%s2861_s1 + $0x24] ss:$16 sps:$4 sm:$0xff]   ;;  %v1932_v4 = vld [vmem:[%s2861_s1 + $0x20] ss:$16 sps:$4 sm:$0xff]   ;;  %v1954_v11 = vld [vmem:[%s2861_s1 + $0x8] ss:$16 sps:$4 sm:$0xff]   ;;  %292 = vmatprep.subr.bf16.mxu1 %v1952_v10 }
   0x3   :  { %250 = vmatpush1.bf16.msra.mxu0 %v1929_v2  ;;  %v1933_v5 = vld [vmem:[%s2861_s1 + $0x44] ss:$16 sps:$4 sm:$0xff]   ;;  %v1935_v6 = vld [vmem:[%s2861_s1 + $0x40] ss:$16 sps:$4 sm:$0xff]   ;;  %v1955_v12 = vld [vmem:[%s2861_s1 + $0x2c] ss:$16 sps:$4 sm:$0xff]   ;;  %293 = vmatpush1.bf16.msra.mxu1 %v1954_v11 }
   0x4   :  { %251 = vmatprep.subr.bf16.mxu0 %v1930_v3  ;;  %v1936_v7 = vld [vmem:[%s2861_s1 + $0x64] ss:$16 sps:$4 sm:$0xff]   ;;  %v1938_v8 = vld [vmem:[%s2861_s1 + $0x60] ss:$16 sps:$4 sm:$0xff]   ;;  %v1957_v14 = vld [vmem:[%s2861_s1 + $0x28] ss:$16 sps:$4 sm:$0xff]   ;;  %294 = vmatprep.subr.bf16.mxu1 %v1955_v12 }
   0x5   :  { %v1939_v9 = vld [vmem:[%s2861_s1 + $0x84] ss:$16 sps:$4 sm:$0xff]   ;;  %v1941_v13 = vld [vmem:[%s2861_s1 + $0x80] ss:$16 sps:$4 sm:$0xff]   ;;  %v1958_v16 = vld [vmem:[%s2861_s1 + $0x4c] ss:$16 sps:$4 sm:$0xff]  }
   0x6   :  { %v1942_v15 = vld [vmem:[%s2861_s1 + $0xa4] ss:$16 sps:$4 sm:$0xff]   ;;  %v1944_v17 = vld [vmem:[%s2861_s1 + $0xa0] ss:$16 sps:$4 sm:$0xff]   ;;  %v1960_v18 = vld [vmem:[%s2861_s1 + $0x48] ss:$16 sps:$4 sm:$0xff]  }
   0x7   :  { %252 = vmatpush1.bf16.msra.mxu0 %v1932_v4  ;;  %295 = vmatpush1.bf16.msra.mxu1 %v1957_v14  ;;  %v1945_v19 = vld [vmem:[%s2861_s1 + $0xc4] ss:$16 sps:$4 sm:$0xff]   ;;  %v1961_v20 = vld [vmem:[%s2861_s1 + $0x6c] ss:$16 sps:$4 sm:$0xff]   ;;  %v1947_v21 = vld [vmem:[%s2861_s1 + $0xc0] ss:$16 sps:$4 sm:$0xff]  }
   0x8   :  { %253 = vmatprep.subr.bf16.mxu0 %v1933_v5  ;;  %296 = vmatprep.subr.bf16.mxu1 %v1958_v16  ;;  %v1963_v22 = vld [vmem:[%s2861_s1 + $0x68] ss:$16 sps:$4 sm:$0xff]   ;;  %v1948_v23 = vld [vmem:[%s2861_s1 + $0xe4] ss:$16 sps:$4 sm:$0xff]   ;;  %v1964_v24 = vld [vmem:[%s2861_s1 + $0x8c] ss:$16 sps:$4 sm:$0xff]  }
   0x9   :  { %v1950_v25 = vld [vmem:[%s2861_s1 + $0xe0] ss:$16 sps:$4 sm:$0xff]   ;;  %v1966_v26 = vld [vmem:[%s2861_s1 + $0x88] ss:$16 sps:$4 sm:$0xff]   ;;  %v1967_v27 = vld [vmem:[%s2861_s1 + $0xac] ss:$16 sps:$4 sm:$0xff]  }
   0xa   :  { %v1978_v28 = vld [vmem:[%s2863_s3 + $0x4] ss:$16 sps:$4 sm:$0xff]   ;;  %v1969_v30 = vld [vmem:[%s2861_s1 + $0xa8] ss:$16 sps:$4 sm:$0xff]   ;;  %v1976_v31 = vld [vmem:[%s2863_s3] ss:$16 sps:$4 sm:$0xff]  }
   0xb   :  { %254 = vmatpush1.bf16.msra.mxu0 %v1935_v6  ;;  %297 = vmatpush1.bf16.msra.mxu1 %v1960_v18  ;;  %v1951_v29 = vld [vmem:[%s2862_s0] sm:$0xff]   ;;  %v1970_v32 = vld [vmem:[%s2861_s1 + $0xcc] ss:$16 sps:$4 sm:$0xff]   ;;  %v1972_v34 = vld [vmem:[%s2861_s1 + $0xc8] ss:$16 sps:$4 sm:$0xff]  }
   0xc   :  { %255 = vmatprep.subr.bf16.mxu0 %v1936_v7  ;;  %298 = vmatprep.subr.bf16.mxu1 %v1961_v20  ;;  %v1984_v33 = vld [vmem:[%s2863_s3 + $0x24] ss:$16 sps:$4 sm:$0xff]   ;;  %v1982_v35 = vld [vmem:[%s2863_s3 + $0x20] ss:$16 sps:$4 sm:$0xff]   ;;  %v1973_v36 = vld [vmem:[%s2861_s1 + $0xec] ss:$16 sps:$4 sm:$0xff]  }
   0xd   :  { %v1990_v37 = vld [vmem:[%s2863_s3 + $0x44] ss:$16 sps:$4 sm:$0xff]   ;;  %v1975_v38 = vld [vmem:[%s2861_s1 + $0xe8] ss:$16 sps:$4 sm:$0xff]   ;;  %v1988_v39 = vld [vmem:[%s2863_s3 + $0x40] ss:$16 sps:$4 sm:$0xff]  }
   0xe   :  { %v1981_v40 = vld [vmem:[%s2863_s3 + $0xc] ss:$16 sps:$4 sm:$0xff]   ;;  %v1996_v41 = vld [vmem:[%s2863_s3 + $0x64] ss:$16 sps:$4 sm:$0xff]   ;;  %v1979_v42 = vld [vmem:[%s2863_s3 + $0x8] ss:$16 sps:$4 sm:$0xff]  }
   0xf   :  { %256 = vmatpush1.bf16.msra.mxu0 %v1938_v8  ;;  %299 = vmatpush1.bf16.msra.mxu1 %v1963_v22  ;;  %v1994_v43 = vld [vmem:[%s2863_s3 + $0x60] ss:$16 sps:$4 sm:$0xff]   ;;  %v1987_v44 = vld [vmem:[%s2863_s3 + $0x2c] ss:$16 sps:$4 sm:$0xff]   ;;  %v2002_v45 = vld [vmem:[%s2863_s3 + $0x84] ss:$16 sps:$4 sm:$0xff]  }
  0x10   :  { %257 = vmatprep.subr.bf16.mxu0 %v1939_v9  ;;  %300 = vmatprep.subr.bf16.mxu1 %v1964_v24  ;;  %v1985_v46 = vld [vmem:[%s2863_s3 + $0x28] ss:$16 sps:$4 sm:$0xff]   ;;  %v2000_v47 = vld [vmem:[%s2863_s3 + $0x80] ss:$16 sps:$4 sm:$0xff]   ;;  %v1993_v48 = vld [vmem:[%s2863_s3 + $0x4c] ss:$16 sps:$4 sm:$0xff]  }
  0x11   :  { %v2008_v49 = vld [vmem:[%s2863_s3 + $0xa4] ss:$16 sps:$4 sm:$0xff]   ;;  %v1991_v50 = vld [vmem:[%s2863_s3 + $0x48] ss:$16 sps:$4 sm:$0xff]   ;;  %v2006_v51 = vld [vmem:[%s2863_s3 + $0xa0] ss:$16 sps:$4 sm:$0xff]  }
  0x12   :  { %v1999_v52 = vld [vmem:[%s2863_s3 + $0x6c] ss:$16 sps:$4 sm:$0xff]   ;;  %v2014_v53 = vld [vmem:[%s2863_s3 + $0xc4] ss:$16 sps:$4 sm:$0xff]   ;;  %v1997_v54 = vld [vmem:[%s2863_s3 + $0x68] ss:$16 sps:$4 sm:$0xff]  }
  0x13   :  { %258 = vmatpush1.bf16.msra.mxu0 %v1941_v13  ;;  %301 = vmatpush1.bf16.msra.mxu1 %v1966_v26  ;;  %v2012_v55 = vld [vmem:[%s2863_s3 + $0xc0] ss:$16 sps:$4 sm:$0xff]   ;;  %v2005_v56 = vld [vmem:[%s2863_s3 + $0x8c] ss:$16 sps:$4 sm:$0xff]   ;;  %v2020_v57 = vld [vmem:[%s2863_s3 + $0xe4] ss:$16 sps:$4 sm:$0xff]  }
  0x14   :  { %259 = vmatprep.subr.bf16.mxu0 %v1942_v15  ;;  %302 = vmatprep.subr.bf16.mxu1 %v1967_v27  ;;  %v2003_v58 = vld [vmem:[%s2863_s3 + $0x88] ss:$16 sps:$4 sm:$0xff]   ;;  %v2011_v59 = vld [vmem:[%s2863_s3 + $0xac] ss:$16 sps:$4 sm:$0xff]   ;;  %v2018_v60 = vld [vmem:[%s2863_s3 + $0xe0] ss:$16 sps:$4 sm:$0xff]  }
  0x15   :  { %v2026_v61 = vld [vmem:[%s2863_s3 + $0x104] ss:$16 sps:$4 sm:$0xff]   ;;  %v2009_v62 = vld [vmem:[%s2863_s3 + $0xa8] ss:$16 sps:$4 sm:$0xff]   ;;  %v2024_v63 = vld [vmem:[%s2863_s3 + $0x100] ss:$16 sps:$4 sm:$0xff]  }
  0x16   :  { %v2017_v0 = vld [vmem:[%s2863_s3 + $0xcc] ss:$16 sps:$4 sm:$0xff]   ;;  %v2032_v1 = vld [vmem:[%s2863_s3 + $0x124] ss:$16 sps:$4 sm:$0xff]   ;;  %v2015_v2 = vld [vmem:[%s2863_s3 + $0xc8] ss:$16 sps:$4 sm:$0xff]  }
  0x17   :  { %260 = vmatpush1.bf16.msra.mxu0 %v1944_v17  ;;  %303 = vmatpush1.bf16.msra.mxu1 %v1969_v30  ;;  %v2030_v3 = vld [vmem:[%s2863_s3 + $0x120] ss:$16 sps:$4 sm:$0xff]   ;;  %v2023_v4 = vld [vmem:[%s2863_s3 + $0xec] ss:$16 sps:$4 sm:$0xff]   ;;  %v2038_v5 = vld [vmem:[%s2863_s3 + $0x144] ss:$16 sps:$4 sm:$0xff]  }
  0x18   :  { %261 = vmatprep.subr.bf16.mxu0 %v1945_v19  ;;  %304 = vmatprep.subr.bf16.mxu1 %v1970_v32  ;;  %v2021_v6 = vld [vmem:[%s2863_s3 + $0xe8] ss:$16 sps:$4 sm:$0xff]   ;;  %v2036_v7 = vld [vmem:[%s2863_s3 + $0x140] ss:$16 sps:$4 sm:$0xff]   ;;  %v2029_v8 = vld [vmem:[%s2863_s3 + $0x10c] ss:$16 sps:$4 sm:$0xff]  }
  0x19   :  { %v2044_v9 = vld [vmem:[%s2863_s3 + $0x164] ss:$16 sps:$4 sm:$0xff]   ;;  %v2027_v10 = vld [vmem:[%s2863_s3 + $0x108] ss:$16 sps:$4 sm:$0xff]   ;;  %v2042_v11 = vld [vmem:[%s2863_s3 + $0x160] ss:$16 sps:$4 sm:$0xff]  }
  0x1a   :  { %v2035_v12 = vld [vmem:[%s2863_s3 + $0x12c] ss:$16 sps:$4 sm:$0xff]   ;;  %v2050_v13 = vld [vmem:[%s2863_s3 + $0x184] ss:$16 sps:$4 sm:$0xff]   ;;  %v2033_v14 = vld [vmem:[%s2863_s3 + $0x128] ss:$16 sps:$4 sm:$0xff]  }
  0x1b   :  { %262 = vmatpush1.bf16.msra.mxu0 %v1947_v21  ;;  %305 = vmatpush1.bf16.msra.mxu1 %v1972_v34  ;;  %v2048_v15 = vld [vmem:[%s2863_s3 + $0x180] ss:$16 sps:$4 sm:$0xff]   ;;  %v2041_v16 = vld [vmem:[%s2863_s3 + $0x14c] ss:$16 sps:$4 sm:$0xff]   ;;  %v2056_v17 = vld [vmem:[%s2863_s3 + $0x1a4] ss:$16 sps:$4 sm:$0xff]  }
  0x1c   :  { %263 = vmatprep.subr.bf16.mxu0 %v1948_v23  ;;  %306 = vmatprep.subr.bf16.mxu1 %v1973_v36  ;;  %v2039_v18 = vld [vmem:[%s2863_s3 + $0x148] ss:$16 sps:$4 sm:$0xff]   ;;  %v2054_v19 = vld [vmem:[%s2863_s3 + $0x1a0] ss:$16 sps:$4 sm:$0xff]   ;;  %v2047_v20 = vld [vmem:[%s2863_s3 + $0x16c] ss:$16 sps:$4 sm:$0xff]   ;;  %v63_v36 = vlaneseq }
  0x1d   :  { %v2045_v21 = vld [vmem:[%s2863_s3 + $0x168] ss:$16 sps:$4 sm:$0xff]   ;;  %v2053_v22 = vld [vmem:[%s2863_s3 + $0x18c] ss:$16 sps:$4 sm:$0xff]   ;;  %v2062_v26 = vld [vmem:[%s2863_s3 + $0x1c4] ss:$16 sps:$4 sm:$0xff]  }
  0x1e   :  { %v2051_v23 = vld [vmem:[%s2863_s3 + $0x188] ss:$16 sps:$4 sm:$0xff]   ;;  %v2059_v24 = vld [vmem:[%s2863_s3 + $0x1ac] ss:$16 sps:$4 sm:$0xff]   ;;  %v2068_v30 = vld [vmem:[%s2863_s3 + $0x1e4] ss:$16 sps:$4 sm:$0xff]  }
  0x1f   :  { %264 = vmatpush1.bf16.msra.mxu0 %v1950_v25  ;;  %307 = vmatpush1.bf16.msra.mxu1 %v1975_v38  ;;  %v2057_v25 = vld [vmem:[%s2863_s3 + $0x1a8] ss:$16 sps:$4 sm:$0xff]   ;;  %v2065_v27 = vld [vmem:[%s2863_s3 + $0x1cc] ss:$16 sps:$4 sm:$0xff]   ;;  %v2066_v32 = vld [vmem:[%s2863_s3 + $0x1e0] ss:$16 sps:$4 sm:$0xff]  }
  0x20   :  { %1137 = vmatprep.subr.bf16.mxu0 %v1978_v28  ;;  %1223 = vmatprep.subr.bf16.mxu1 %v1981_v40  ;;  %v2060_v28 = vld [vmem:[%s2863_s3 + $0x1c0] ss:$16 sps:$4 sm:$0xff]   ;;  %v2074_v34 = vld [vmem:[%s2863_s3 + $0x204] ss:$16 sps:$4 sm:$0xff]  }
  0x22   :  { %282 = vmatmul.mubr.bf16.vlgmr.msra.gmra.mrb[0].mxu0 %v1951_v29  ;;  %325 = vmatmul.mubr.bf16.vlgmr.msra.gmra.mrb[0].mxu1 %v1951_v29  ;;  %v2063_v29 = vld [vmem:[%s2863_s3 + $0x1c8] ss:$16 sps:$4 sm:$0xff]  }
  0x23   :  { %1138 = vmatpush1.bf16.msra.mxu0 %v1976_v31  ;;  %1224 = vmatpush1.bf16.msra.mxu1 %v1979_v42  ;;  %v2071_v31 = vld [vmem:[%s2863_s3 + $0x1ec] ss:$16 sps:$4 sm:$0xff]  }
  0x24   :  { %1139 = vmatprep.subr.bf16.mxu0 %v1984_v33  ;;  %1225 = vmatprep.subr.bf16.mxu1 %v1987_v44  ;;  %v2069_v33 = vld [vmem:[%s2863_s3 + $0x1e8] ss:$16 sps:$4 sm:$0xff]  }
  0x27   :  { %1140 = vmatpush1.bf16.msra.mxu0 %v1982_v35  ;;  %1226 = vmatpush1.bf16.msra.mxu1 %v1985_v46  ;;  %v2077_v35 = vld [vmem:[%s2863_s3 + $0x20c] ss:$16 sps:$4 sm:$0xff]  }
  0x28   :  { %1141 = vmatprep.subr.bf16.mxu0 %v1990_v37  ;;  %1227 = vmatprep.subr.bf16.mxu1 %v1993_v48  ;;  %v2538_v37 = vshrl.u32 %v63_v36, 7  ;;  %v2111_v36 = vld [vmem:[%s2863_s3 + $0x2c8] ss:$16 sps:$4 sm:$0xff]  }
  0x2a   :  { %v65_v38 = vsub.s32 0, %v2538_v37  ;;  %v69_v40 = vsub.s32 1, %v2538_v37 }
  0x2b   :  { %1142 = vmatpush1.bf16.msra.mxu0 %v1988_v39  ;;  %1228 = vmatpush1.bf16.msra.mxu1 %v1991_v50  ;;  %v61_v39 = vld [vmem:[%s2865_s2] sm:$0xf] }
  0x2c   :  { %1143 = vmatprep.subr.bf16.mxu0 %v1996_v41  ;;  %1229 = vmatprep.subr.bf16.mxu1 %v1999_v52  ;;  %v66_v41 = vrot.slane %v61_v39, %v65_v38  ;;  %v70_v42 = vrot.slane %v61_v39, %v69_v40 }
  0x2f   :  { %1144 = vmatpush1.bf16.msra.mxu0 %v1994_v43  ;;  %1230 = vmatpush1.bf16.msra.mxu1 %v1997_v54 }
  0x30   :  { %1145 = vmatprep.subr.bf16.mxu0 %v2002_v45  ;;  %1231 = vmatprep.subr.bf16.mxu1 %v2005_v56  ;;  %v77_v56 = vsub.s32 3, %v2538_v37 }
  0x33   :  { %1146 = vmatpush1.bf16.msra.mxu0 %v2000_v47  ;;  %1232 = vmatpush1.bf16.msra.mxu1 %v2003_v58 }
  0x34   :  { %1147 = vmatprep.subr.bf16.mxu0 %v2008_v49  ;;  %1233 = vmatprep.subr.bf16.mxu1 %v2011_v59  ;;  %v2072_v59 = vld [vmem:[%s2863_s3 + $0x200] ss:$16 sps:$4 sm:$0xff]  }
  0x37   :  { %1148 = vmatpush1.bf16.msra.mxu0 %v2006_v51  ;;  %1234 = vmatpush1.bf16.msra.mxu1 %v2009_v62  ;;  %v2083_v62 = vld [vmem:[%s2863_s3 + $0x22c] ss:$16 sps:$4 sm:$0xff]  }
  0x38   :  { %1149 = vmatprep.subr.bf16.mxu0 %v2014_v53  ;;  %1235 = vmatprep.subr.bf16.mxu1 %v2017_v0  ;;  %v73_v53 = vsub.s32 2, %v2538_v37  ;;  %v78_v0 = vrot.slane %v61_v39, %v77_v56 }
  0x3b   :  { %1150 = vmatpush1.bf16.msra.mxu0 %v2012_v55  ;;  %1236 = vmatpush1.bf16.msra.mxu1 %v2015_v2  ;;  %v2081_v2 = vld [vmem:[%s2863_s3 + $0x228] ss:$16 sps:$4 sm:$0xff]  }
  0x3c   :  { %1151 = vmatprep.subr.bf16.mxu0 %v2020_v57  ;;  %1237 = vmatprep.subr.bf16.mxu1 %v2023_v4  ;;  %v2086_v4 = vld [vmem:[%s2863_s3 + $0x244] ss:$16 sps:$4 sm:$0xff]  }
  0x3f   :  { %1152 = vmatpush1.bf16.msra.mxu0 %v2018_v60  ;;  %1238 = vmatpush1.bf16.msra.mxu1 %v2021_v6  ;;  %v2075_v60 = vld [vmem:[%s2863_s3 + $0x208] ss:$16 sps:$4 sm:$0xff]  }
  0x40   :  { %1153 = vmatprep.subr.bf16.mxu0 %v2026_v61  ;;  %1239 = vmatprep.subr.bf16.mxu1 %v2029_v8  ;;  %v2080_v61 = vld [vmem:[%s2863_s3 + $0x224] ss:$16 sps:$4 sm:$0xff]  }
  0x43   :  { %1154 = vmatpush1.bf16.msra.mxu0 %v2024_v63  ;;  %1240 = vmatpush1.bf16.msra.mxu1 %v2027_v10  ;;  %v74_v63 = vrot.slane %v61_v39, %v73_v53  ;;  %v2116_v39 = vld [vmem:[%s2863_s3 + $0x2e4] ss:$16 sps:$4 sm:$0xff]  }
  0x44   :  { %1155 = vmatprep.subr.bf16.mxu0 %v2032_v1  ;;  %1241 = vmatprep.subr.bf16.mxu1 %v2035_v12  ;;  %v2078_v1 = vld [vmem:[%s2863_s3 + $0x220] ss:$16 sps:$4 sm:$0xff]  }
  0x47   :  { %1156 = vmatpush1.bf16.msra.mxu0 %v2030_v3  ;;  %1242 = vmatpush1.bf16.msra.mxu1 %v2033_v14  ;;  %v2087_v14 = vld [vmem:[%s2863_s3 + $0x248] ss:$16 sps:$4 sm:$0xff]  }
  0x48   :  { %1157 = vmatprep.subr.bf16.mxu0 %v2038_v5  ;;  %1243 = vmatprep.subr.bf16.mxu1 %v2041_v16  ;;  %v2089_v5 = vld [vmem:[%s2863_s3 + $0x24c] ss:$16 sps:$4 sm:$0xff]  }
  0x4b   :  { %1158 = vmatpush1.bf16.msra.mxu0 %v2036_v7  ;;  %1244 = vmatpush1.bf16.msra.mxu1 %v2039_v18  ;;  %v2095_v18 = vld [vmem:[%s2863_s3 + $0x26c] ss:$16 sps:$4 sm:$0xff]  }
  0x4c   :  { %1159 = vmatprep.subr.bf16.mxu0 %v2044_v9  ;;  %1245 = vmatprep.subr.bf16.mxu1 %v2047_v20 }
  0x4f   :  { %1160 = vmatpush1.bf16.msra.mxu0 %v2042_v11  ;;  %1246 = vmatpush1.bf16.msra.mxu1 %v2045_v21 }
  0x50   :  { %1161 = vmatprep.subr.bf16.mxu0 %v2050_v13  ;;  %1247 = vmatprep.subr.bf16.mxu1 %v2053_v22  ;;  %v2084_v13 = vld [vmem:[%s2863_s3 + $0x240] ss:$16 sps:$4 sm:$0xff]  }
  0x51   :  { %v2090_v22 = vld [vmem:[%s2863_s3 + $0x260] ss:$16 sps:$4 sm:$0xff]  }
  0x53   :  { %1162 = vmatpush1.bf16.msra.mxu0 %v2048_v15  ;;  %1248 = vmatpush1.bf16.msra.mxu1 %v2051_v23  ;;  %v2093_v23 = vld [vmem:[%s2863_s3 + $0x268] ss:$16 sps:$4 sm:$0xff]  }
  0x54   :  { %1163 = vmatprep.subr.bf16.mxu0 %v2056_v17  ;;  %1249 = vmatprep.subr.bf16.mxu1 %v2059_v24  ;;  %v2092_v17 = vld [vmem:[%s2863_s3 + $0x264] ss:$16 sps:$4 sm:$0xff]  }
  0x57   :  { %1164 = vmatpush1.bf16.msra.mxu0 %v2054_v19  ;;  %1250 = vmatpush1.bf16.msra.mxu1 %v2057_v25  ;;  %v2098_v25 = vld [vmem:[%s2863_s3 + $0x284] ss:$16 sps:$4 sm:$0xff]  }
  0x58   :  { %1165 = vmatprep.subr.bf16.mxu0 %v2062_v26  ;;  %1251 = vmatprep.subr.bf16.mxu1 %v2065_v27  ;;  %v2101_v26 = vld [vmem:[%s2863_s3 + $0x28c] ss:$16 sps:$4 sm:$0xff]   ;;  %v2096_v27 = vld [vmem:[%s2863_s3 + $0x280] ss:$16 sps:$4 sm:$0xff]  }
  0x5b   :  { %1166 = vmatpush1.bf16.msra.mxu0 %v2060_v28  ;;  %1252 = vmatpush1.bf16.msra.mxu1 %v2063_v29  ;;  %v2099_v28 = vld [vmem:[%s2863_s3 + $0x288] ss:$16 sps:$4 sm:$0xff]   ;;  %v2104_v29 = vld [vmem:[%s2863_s3 + $0x2a4] ss:$16 sps:$4 sm:$0xff]  }
  0x5c   :  { %1167 = vmatprep.subr.bf16.mxu0 %v2068_v30  ;;  %1253 = vmatprep.subr.bf16.mxu1 %v2071_v31  ;;  %v2107_v30 = vld [vmem:[%s2863_s3 + $0x2ac] ss:$16 sps:$4 sm:$0xff]   ;;  %v2102_v31 = vld [vmem:[%s2863_s3 + $0x2a0] ss:$16 sps:$4 sm:$0xff]  }
  0x5f   :  { %1168 = vmatpush1.bf16.msra.mxu0 %v2066_v32  ;;  %1254 = vmatpush1.bf16.msra.mxu1 %v2069_v33  ;;  %v2105_v32 = vld [vmem:[%s2863_s3 + $0x2a8] ss:$16 sps:$4 sm:$0xff]   ;;  %v2110_v33 = vld [vmem:[%s2863_s3 + $0x2c4] ss:$16 sps:$4 sm:$0xff]  }
  0x60   :  { %1180 = vmatprep.subr.bf16.mxu0 %v2074_v34  ;;  %1266 = vmatprep.subr.bf16.mxu1 %v2077_v35  ;;  %v2113_v34 = vld [vmem:[%s2863_s3 + $0x2cc] ss:$16 sps:$4 sm:$0xff]   ;;  %v2108_v35 = vld [vmem:[%s2863_s3 + $0x2c0] ss:$16 sps:$4 sm:$0xff]  }
  0xf5   :  { %v283_v43 = vpop.f32.mrb[0].mxu0  ;;  %v326_v3 = vpop.f32.mrb[0].mxu1 }
  0xf6   :  { %v284_v44 = vadd.f32 %v283_v43, %v66_v41  ;;  %v285_v45 = vpop.f32.mrb[1].mxu0  ;;  %v327_v6 = vadd.f32 %v326_v3, %v74_v63  ;;  %v328_v7 = vpop.f32.mrb[1].mxu1  ;;  %v2117_v43 = vld [vmem:[%s2863_s3 + $0x2e8] ss:$16 sps:$4 sm:$0xff]   ;;  %v2155_v3 = vld [vmem:[%s2863_s3 + $0x3ac] ss:$16 sps:$4 sm:$0xff]  }
  0xf7   :  { %v286_v46 = vadd.f32 %v285_v45, %v70_v42  ;;  %v287_v47 = vpop.f32.mrb[2].mxu0  ;;  %v329_v8 = vadd.f32 %v328_v7, %v78_v0  ;;  %v330_v9 = vpop.f32.mrb[2].mxu1  ;;  %v2125_v45 = vld [vmem:[%s2863_s3 + $0x30c] ss:$16 sps:$4 sm:$0xff]  }
  0xf8   :  { %v288_v48 = vadd.f32 %v287_v47, %v66_v41  ;;  %v289_v49 = vpop.f32.mrb[3].mxu0  ;;  %v335_v51 = vmax.f32 %v284_v44, 0.0  ;;  %v337_v10 = vmax.f32 %v327_v6, 0.0  ;;  %v331_v11 = vadd.f32 %v330_v9, %v74_v63  ;;  %v332_v12 = vpop.f32.mrb[3].mxu1  ;;  %v2119_v41 = vld [vmem:[%s2863_s3 + $0x2ec] ss:$16 sps:$4 sm:$0xff]  }
  0xf9   :  { %v290_v50 = vadd.f32 %v289_v49, %v70_v42  ;;  %v336_v54 = vmax.f32 %v286_v46, 0.0  ;;  %v338_v15 = vmax.f32 %v329_v8, 0.0  ;;  %v333_v16 = vadd.f32 %v332_v12, %v78_v0  ;;  %v2114_v42 = vld [vmem:[%s2863_s3 + $0x2e0] ss:$16 sps:$4 sm:$0xff]   ;;  %v2122_v44 = vld [vmem:[%s2863_s3 + $0x304] ss:$16 sps:$4 sm:$0xff]  }
  0xfa   :  { %v339_v52 = vmax.f32 %v288_v48, 0.0  ;;  %v341_v19 = vmax.f32 %v331_v11, 0.0  ;;  %v2120_v46 = vld [vmem:[%s2863_s3 + $0x300] ss:$16 sps:$4 sm:$0xff]   ;;  %v2123_v47 = vld [vmem:[%s2863_s3 + $0x308] ss:$16 sps:$4 sm:$0xff]  }
  0xfb   :  { %v340_v55 = vmax.f32 %v290_v50, 0.0  ;;  %v342_v20 = vmax.f32 %v333_v16, 0.0  ;;  %v2128_v48 = vld [vmem:[%s2863_s3 + $0x324] ss:$16 sps:$4 sm:$0xff]   ;;  %v2131_v49 = vld [vmem:[%s2863_s3 + $0x32c] ss:$16 sps:$4 sm:$0xff]  }
  0xfc   :  { %v343_v57 = vpack.c.bf16 %v339_v52, %v335_v51  ;;  %v2591_v21 = vpack.c.bf16 %v341_v19, %v337_v10  ;;  %v2126_v50 = vld [vmem:[%s2863_s3 + $0x320] ss:$16 sps:$4 sm:$0xff]   ;;  %v2129_v51 = vld [vmem:[%s2863_s3 + $0x328] ss:$16 sps:$4 sm:$0xff]   ;;  %v2134_v52 = vld [vmem:[%s2863_s3 + $0x344] ss:$16 sps:$4 sm:$0xff]  }
  0xfd   :  { %v344_v58 = vpack.c.bf16 %v340_v55, %v336_v54  ;;  %v346_v24 = vpack.c.bf16 %v342_v20, %v338_v15  ;;  %v2137_v54 = vld [vmem:[%s2863_s3 + $0x34c] ss:$16 sps:$4 sm:$0xff]   ;;  %v2132_v55 = vld [vmem:[%s2863_s3 + $0x340] ss:$16 sps:$4 sm:$0xff]   ;;  %v2158_v6 = vld [vmem:[%s2863_s3 + $0x3c4] ss:$16 sps:$4 sm:$0xff]  }
  0xfe   :  { %v2149_v63 = vld [vmem:[%s2863_s3 + $0x38c] ss:$16 sps:$4 sm:$0xff]   ;;  %v2144_v0 = vld [vmem:[%s2863_s3 + $0x380] ss:$16 sps:$4 sm:$0xff]   ;;  %v2159_v9 = vld [vmem:[%s2863_s3 + $0x3c8] ss:$16 sps:$4 sm:$0xff]  }
  0xff   :  { %1169 = vmatprep.mubr.bf16.mxu0 %v344_v58  ;;  %1255 = vmatprep.mubr.bf16.mxu1 %v344_v58  ;;  %v2140_v58 = vld [vmem:[%s2863_s3 + $0x364] ss:$16 sps:$4 sm:$0xff]   ;;  %v2161_v7 = vld [vmem:[%s2863_s3 + $0x3cc] ss:$16 sps:$4 sm:$0xff]   ;;  %v2156_v8 = vld [vmem:[%s2863_s3 + $0x3c0] ss:$16 sps:$4 sm:$0xff]  }
 0x100   :  { %1170 = vmatmul.mubr.bf16.vlgmr.msra.gmra.mrb[4].mxu0 %v343_v57  ;;  %1256 = vmatmul.mubr.bf16.vlgmr.msra.gmra.mrb[4].mxu1 %v343_v57  ;;  %v2135_v57 = vld [vmem:[%s2863_s3 + $0x348] ss:$16 sps:$4 sm:$0xff]   ;;  %v2164_v10 = vld [vmem:[%s2863_s3 + $0x3e4] ss:$16 sps:$4 sm:$0xff]   ;;  %v2167_v11 = vld [vmem:[%s2863_s3 + $0x3ec] ss:$16 sps:$4 sm:$0xff]  }
 0x101   :  { %1181 = vmatpush1.bf16.msra.mxu0 %v2072_v59  ;;  %1267 = vmatpush1.bf16.msra.mxu1 %v2075_v60  ;;  %v2143_v59 = vld [vmem:[%s2863_s3 + $0x36c] ss:$16 sps:$4 sm:$0xff]   ;;  %v2138_v60 = vld [vmem:[%s2863_s3 + $0x360] ss:$16 sps:$4 sm:$0xff]  }
 0x102   :  { %1182 = vmatprep.subr.bf16.mxu0 %v2080_v61  ;;  %1268 = vmatprep.subr.bf16.mxu1 %v2083_v62  ;;  %v2141_v61 = vld [vmem:[%s2863_s3 + $0x368] ss:$16 sps:$4 sm:$0xff]   ;;  %v2146_v62 = vld [vmem:[%s2863_s3 + $0x384] ss:$16 sps:$4 sm:$0xff]   ;;  %v2162_v12 = vld [vmem:[%s2863_s3 + $0x3e0] ss:$16 sps:$4 sm:$0xff]  }
 0x103   :  { %1212 = vmatprep.mubr.bf16.mxu0 %v346_v24  ;;  %1298 = vmatprep.mubr.bf16.mxu1 %v346_v24  ;;  %v2169_v15 = vld [vmem:[%s2864_s5 + $0xc0] sm:$0xff]   ;;  %v2173_v19 = vld [vmem:[%s2864_s5 + $0xc8] sm:$0xff]   ;;  %v2178_v24 = vld [vmem:[%s2864_s5 + $0x10] sm:$0xff]  }
 0x104   :  { %v2170_v16 = vld [vmem:[%s2864_s5] sm:$0xff]   ;;  %v2174_v20 = vld [vmem:[%s2864_s5 + $0x8] sm:$0xff]  }
 0x105   :  { %1183 = vmatpush1.bf16.msra.mxu0 %v2078_v1  ;;  %1269 = vmatpush1.bf16.msra.mxu1 %v2081_v2  ;;  %v2147_v1 = vld [vmem:[%s2863_s3 + $0x388] ss:$16 sps:$4 sm:$0xff]   ;;  %v2152_v2 = vld [vmem:[%s2863_s3 + $0x3a4] ss:$16 sps:$4 sm:$0xff]  }
 0x106   :  { %1184 = vmatprep.subr.bf16.mxu0 %v2086_v4  ;;  %1270 = vmatprep.subr.bf16.mxu1 %v2089_v5  ;;  %v2150_v4 = vld [vmem:[%s2863_s3 + $0x3a0] ss:$16 sps:$4 sm:$0xff]   ;;  %v2153_v5 = vld [vmem:[%s2863_s3 + $0x3a8] ss:$16 sps:$4 sm:$0xff]  }
 0x109   :  { %1185 = vmatpush1.bf16.msra.mxu0 %v2084_v13  ;;  %1271 = vmatpush1.bf16.msra.mxu1 %v2087_v14  ;;  %v2165_v13 = vld [vmem:[%s2863_s3 + $0x3e8] ss:$16 sps:$4 sm:$0xff]   ;;  %v2168_v14 = vld [vmem:[%s2864_s5 + $0x40] sm:$0xff]  }
 0x10a   :  { %1186 = vmatprep.subr.bf16.mxu0 %v2092_v17  ;;  %1272 = vmatprep.subr.bf16.mxu1 %v2095_v18  ;;  %v2171_v17 = vld [vmem:[%s2864_s5 + $0x80] sm:$0xff]   ;;  %v2172_v18 = vld [vmem:[%s2864_s5 + $0x48] sm:$0xff]  }
 0x10d   :  { %1187 = vmatpush1.bf16.msra.mxu0 %v2090_v22  ;;  %1273 = vmatpush1.bf16.msra.mxu1 %v2093_v23  ;;  %v2175_v22 = vld [vmem:[%s2864_s5 + $0x88] sm:$0xff]   ;;  %v2176_v23 = vld [vmem:[%s2864_s5 + $0x50] sm:$0xff]  }
 0x10e   :  { %1188 = vmatprep.subr.bf16.mxu0 %v2098_v25  ;;  %1274 = vmatprep.subr.bf16.mxu1 %v2101_v26  ;;  %v2179_v25 = vld [vmem:[%s2864_s5 + $0x90] sm:$0xff]   ;;  %v2180_v26 = vld [vmem:[%s2864_s5 + $0x58] sm:$0xff]  }
 0x111   :  { %1189 = vmatpush1.bf16.msra.mxu0 %v2096_v27  ;;  %1275 = vmatpush1.bf16.msra.mxu1 %v2099_v28  ;;  %v2181_v27 = vld [vmem:[%s2864_s5 + $0xd8] sm:$0xff]  }
 0x112   :  { %1190 = vmatprep.subr.bf16.mxu0 %v2104_v29  ;;  %1276 = vmatprep.subr.bf16.mxu1 %v2107_v30  ;;  %v2182_v28 = vld [vmem:[%s2864_s5 + $0x18] sm:$0xff]   ;;  %v2184_v30 = vld [vmem:[%s2864_s5 + $0x60] sm:$0xff]  }
 0x113   :  { %v2183_v29 = vld [vmem:[%s2864_s5 + $0x98] sm:$0xff]  }
 0x115   :  { %1191 = vmatpush1.bf16.msra.mxu0 %v2102_v31  ;;  %1277 = vmatpush1.bf16.msra.mxu1 %v2105_v32  ;;  %v2185_v31 = vld [vmem:[%s2864_s5 + $0xe0] sm:$0xff]  }
 0x116   :  { %1192 = vmatprep.subr.bf16.mxu0 %v2110_v33  ;;  %1278 = vmatprep.subr.bf16.mxu1 %v2113_v34  ;;  %v2186_v32 = vld [vmem:[%s2864_s5 + $0x20] sm:$0xff]   ;;  %v2188_v34 = vld [vmem:[%s2864_s5 + $0x68] sm:$0xff]  }
 0x117   :  { %v2187_v33 = vld [vmem:[%s2864_s5 + $0xa0] sm:$0xff]  }
 0x119   :  { %1193 = vmatpush1.bf16.msra.mxu0 %v2108_v35  ;;  %1279 = vmatpush1.bf16.msra.mxu1 %v2111_v36  ;;  %v2189_v35 = vld [vmem:[%s2864_s5 + $0xe8] sm:$0xff]  }
 0x11a   :  { %1194 = vmatprep.subr.bf16.mxu0 %v2116_v39  ;;  %1280 = vmatprep.subr.bf16.mxu1 %v2119_v41  ;;  %v2190_v36 = vld [vmem:[%s2864_s5 + $0x28] sm:$0xff]   ;;  %v2192_v41 = vld [vmem:[%s2864_s5 + $0x70] sm:$0xff]  }
 0x11b   :  { %v2191_v39 = vld [vmem:[%s2864_s5 + $0xa8] sm:$0xff]  }
 0x11d   :  { %1195 = vmatpush1.bf16.msra.mxu0 %v2114_v42  ;;  %1281 = vmatpush1.bf16.msra.mxu1 %v2117_v43  ;;  %v2193_v42 = vld [vmem:[%s2864_s5 + $0xf0] sm:$0xff]  }
 0x11e   :  { %1196 = vmatprep.subr.bf16.mxu0 %v2122_v44  ;;  %1282 = vmatprep.subr.bf16.mxu1 %v2125_v45  ;;  %v2194_v43 = vld [vmem:[%s2864_s5 + $0x30] sm:$0xff]   ;;  %v2196_v45 = vld [vmem:[%s2864_s5 + $0x78] sm:$0xff]  }
 0x11f   :  { %v2195_v44 = vld [vmem:[%s2864_s5 + $0xb0] sm:$0xff]  }
 0x121   :  { %1197 = vmatpush1.bf16.msra.mxu0 %v2120_v46  ;;  %1283 = vmatpush1.bf16.msra.mxu1 %v2123_v47  ;;  %v2197_v46 = vld [vmem:[%s2864_s5 + $0xf8] sm:$0xff]  }
 0x122   :  { %1198 = vmatprep.subr.bf16.mxu0 %v2128_v48  ;;  %1284 = vmatprep.subr.bf16.mxu1 %v2131_v49  ;;  %v2198_v47 = vld [vmem:[%s2864_s5 + $0x38] sm:$0xff]   ;;  %v475_v49 = vld [vmem:[%s2866_s4] sm:$0xf] }
 0x123   :  { %v2199_v48 = vld [vmem:[%s2864_s5 + $0xb8] sm:$0xff]  }
 0x125   :  { %1199 = vmatpush1.bf16.msra.mxu0 %v2126_v50  ;;  %1285 = vmatpush1.bf16.msra.mxu1 %v2129_v51  ;;  %v480_v50 = vrot.slane %v475_v49, %v65_v38  ;;  %v488_v51 = vrot.slane %v475_v49, %v73_v53 }
 0x126   :  { %1200 = vmatprep.subr.bf16.mxu0 %v2134_v52  ;;  %1286 = vmatprep.subr.bf16.mxu1 %v2137_v54  ;;  %v484_v52 = vrot.slane %v475_v49, %v69_v40  ;;  %v492_v54 = vrot.slane %v475_v49, %v77_v56 }
 0x129   :  { %1201 = vmatpush1.bf16.msra.mxu0 %v2132_v55  ;;  %1287 = vmatpush1.bf16.msra.mxu1 %v2135_v57 }
 0x12a   :  { %1202 = vmatprep.subr.bf16.mxu0 %v2140_v58  ;;  %1288 = vmatprep.subr.bf16.mxu1 %v2143_v59 }
 0x12d   :  { %1203 = vmatpush1.bf16.msra.mxu0 %v2138_v60  ;;  %1289 = vmatpush1.bf16.msra.mxu1 %v2141_v61 }
 0x12e   :  { %1204 = vmatprep.subr.bf16.mxu0 %v2146_v62  ;;  %1290 = vmatprep.subr.bf16.mxu1 %v2149_v63 }
 0x131   :  { %1205 = vmatpush1.bf16.msra.mxu0 %v2144_v0  ;;  %1291 = vmatpush1.bf16.msra.mxu1 %v2147_v1 }
 0x132   :  { %1206 = vmatprep.subr.bf16.mxu0 %v2152_v2  ;;  %1292 = vmatprep.subr.bf16.mxu1 %v2155_v3 }
 0x135   :  { %1207 = vmatpush1.bf16.msra.mxu0 %v2150_v4  ;;  %1293 = vmatpush1.bf16.msra.mxu1 %v2153_v5 }
 0x136   :  { %1208 = vmatprep.subr.bf16.mxu0 %v2158_v6  ;;  %1294 = vmatprep.subr.bf16.mxu1 %v2161_v7 }
 0x139   :  { %1209 = vmatpush1.bf16.msra.mxu0 %v2156_v8  ;;  %1295 = vmatpush1.bf16.msra.mxu1 %v2159_v9 }
 0x13a   :  { %1210 = vmatprep.subr.bf16.mxu0 %v2164_v10  ;;  %1296 = vmatprep.subr.bf16.mxu1 %v2167_v11 }
 0x13d   :  { %1211 = vmatpush1.bf16.msra.mxu0 %v2162_v12  ;;  %1297 = vmatpush1.bf16.msra.mxu1 %v2165_v13 }
 0x13e   :  { %1866 = vmatprep.subr.bf16.mxu0 %v2168_v14  ;;  %1888 = vmatprep.subr.bf16.mxu1 %v2169_v15 }
 0x140   :  { %1213 = vmatmul.mubr.bf16.vlgmr.msra.gmra.mrb[4].mxu0 %v2591_v21  ;;  %1299 = vmatmul.mubr.bf16.vlgmr.msra.gmra.mrb[4].mxu1 %v2591_v21  ;;  %v2177_v21 = vld [vmem:[%s2864_s5 + $0xd0] sm:$0xff]  }
 0x141   :  { %1867 = vmatpush3.bf16.msra.mxu0 %v2170_v16  ;;  %1889 = vmatpush3.bf16.msra.mxu1 %v2171_v17  ;;  %v1833_v17 = vld [vmem:[%s2867_s6] ss:$0 sm:$0xff] }
 0x142   :  { %1868 = vmatprep.subr.bf16.mxu0 %v2172_v18  ;;  %1890 = vmatprep.subr.bf16.mxu1 %v2173_v19 }
 0x145   :  { %1869 = vmatpush3.bf16.msra.mxu0 %v2174_v20  ;;  %1891 = vmatpush3.bf16.msra.mxu1 %v2175_v22 }
 0x146   :  { %1870 = vmatprep.subr.bf16.mxu0 %v2176_v23  ;;  %1892 = vmatprep.subr.bf16.mxu1 %v2177_v21 }
 0x149   :  { %1871 = vmatpush3.bf16.msra.mxu0 %v2178_v24  ;;  %1893 = vmatpush3.bf16.msra.mxu1 %v2179_v25 }
 0x14a   :  { %1872 = vmatprep.subr.bf16.mxu0 %v2180_v26  ;;  %1894 = vmatprep.subr.bf16.mxu1 %v2181_v27 }
 0x14d   :  { %1873 = vmatpush3.bf16.msra.mxu0 %v2182_v28  ;;  %1895 = vmatpush3.bf16.msra.mxu1 %v2183_v29 }
 0x14e   :  { %1874 = vmatprep.subr.bf16.mxu0 %v2184_v30  ;;  %1896 = vmatprep.subr.bf16.mxu1 %v2185_v31 }
 0x151   :  { %1875 = vmatpush3.bf16.msra.mxu0 %v2186_v32  ;;  %1897 = vmatpush3.bf16.msra.mxu1 %v2187_v33 }
 0x152   :  { %1876 = vmatprep.subr.bf16.mxu0 %v2188_v34  ;;  %1898 = vmatprep.subr.bf16.mxu1 %v2189_v35 }
 0x155   :  { %1877 = vmatpush3.bf16.msra.mxu0 %v2190_v36  ;;  %1899 = vmatpush3.bf16.msra.mxu1 %v2191_v39 }
 0x156   :  { %1878 = vmatprep.subr.bf16.mxu0 %v2192_v41  ;;  %1900 = vmatprep.subr.bf16.mxu1 %v2193_v42 }
 0x159   :  { %1879 = vmatpush3.bf16.msra.mxu0 %v2194_v43  ;;  %1901 = vmatpush3.bf16.msra.mxu1 %v2195_v44 }
 0x15a   :  { %1880 = vmatprep.subr.bf16.mxu0 %v2196_v45  ;;  %1902 = vmatprep.subr.bf16.mxu1 %v2197_v46 }
 0x15d   :  { %1881 = vmatpush3.bf16.msra.mxu0 %v2198_v47  ;;  %1903 = vmatpush3.bf16.msra.mxu1 %v2199_v48 }
 0x213   :  { %v1214_v55 = vpop.f32.mrb[4].mxu0  ;;  %v1300_v57 = vpop.f32.mrb[4].mxu1 }
 0x214   :  { %v1910_v58 = vadd.f32 %v1214_v55, %v480_v50  ;;  %v1914_v59 = vadd.f32 %v1300_v57, %v488_v51  ;;  %v1216_v60 = vpop.f32.mrb[5].mxu0  ;;  %v1302_v61 = vpop.f32.mrb[5].mxu1 }
 0x215   :  { %v1911_v62 = vadd.f32 %v1216_v60, %v484_v52  ;;  %v1915_v63 = vadd.f32 %v1302_v61, %v492_v54  ;;  %v1218_v0 = vpop.f32.mrb[6].mxu0  ;;  %v1304_v1 = vpop.f32.mrb[6].mxu1 }
 0x216   :  { %v1912_v38 = vadd.f32 %v1218_v0, %v480_v50  ;;  %v1916_v2 = vadd.f32 %v1304_v1, %v488_v51  ;;  %v1220_v3 = vpop.f32.mrb[7].mxu0  ;;  %v1306_v53 = vpop.f32.mrb[7].mxu1  ;;  %v1309_v40 = vmax.f32 %v1910_v58, 0.0  ;;  %v1311_v6 = vmax.f32 %v1914_v59, 0.0 }
 0x217   :  { %v1913_v4 = vadd.f32 %v1220_v3, %v484_v52  ;;  %v1917_v5 = vadd.f32 %v1306_v53, %v492_v54  ;;  %v1310_v7 = vmax.f32 %v1911_v62, 0.0  ;;  %v1312_v8 = vmax.f32 %v1915_v63, 0.0 }
 0x218   :  { %v1313_v37 = vmax.f32 %v1912_v38, 0.0  ;;  %v1315_v56 = vmax.f32 %v1916_v2, 0.0 }
 0x219   :  { %v1314_v9 = vmax.f32 %v1913_v4, 0.0  ;;  %v1316_v10 = vmax.f32 %v1917_v5, 0.0 }
 0x21a   :  { %v1317_v11 = vpack.c.bf16 %v1313_v37, %v1309_v40  ;;  %v1319_v12 = vpack.c.bf16 %v1315_v56, %v1311_v6 }
 0x21b   :  { %v1318_v13 = vpack.c.bf16 %v1314_v9, %v1310_v7  ;;  %v1320_v14 = vpack.c.bf16 %v1316_v10, %v1312_v8 }
 0x21d   :  { %1616 = vmatprep.mubr.bf16.mxu0 %v1318_v13  ;;  %1657 = vmatprep.mubr.bf16.mxu1 %v1320_v14 }
 0x21e   :  { %1617 = vmatmul.mubr.bf16.vlgmr.msra.gmra.mrb[8].mxu0 %v1317_v11  ;;  %1658 = vmatmul.mubr.bf16.vlgmr.msra.gmra.mrb[8].mxu1 %v1319_v12 }
 0x2f1   :  { %v1882_v15 = vpop.f32.mrb[8].mxu0  ;;  %v1904_v16 = vpop.f32.mrb[8].mxu1 }
 0x2f2   :  { %v1883_v18 = vpop.f32.mrb[9].mxu0  ;;  %v1905_v19 = vpop.f32.mrb[9].mxu1 }
 0x2f3   :  { %v1884_v20 = vadd.f32 %v1883_v18, %v1882_v15  ;;  %v1906_v22 = vadd.f32 %v1905_v19, %v1904_v16  ;;  %v1885_v23 = vpop.f32.mrb[10].mxu0  ;;  %v1907_v21 = vpop.f32.mrb[10].mxu1 }
 0x2f4   :  { %v1886_v24 = vpop.f32.mrb[11].mxu0  ;;  %v1908_v25 = vpop.f32.mrb[11].mxu1 }
 0x2f5   :  { %v1619_v26 = vadd.f32 %v1884_v20, %v1833_v17  ;;  %v1887_v27 = vadd.f32 %v1886_v24, %v1885_v23  ;;  %v1909_v28 = vadd.f32 %v1908_v25, %v1907_v21 }
 0x2f7   :  { %v1660_v29 = vadd.f32 %v1906_v22, %v1619_v26  ;;  %v1622_v30 = vadd.f32 %v1887_v27, %v1833_v17 }
 0x2f9   :  { %1666 = vst [vmem:[%s2868_s7] sm:$0xff] %v1660_v29  ;;  %v1663_v31 = vadd.f32 %v1909_v28, %v1622_v30 }
 0x2fb   :  { %1667 = vst [vmem:[%s2868_s7 + $0x8] sm:$0xff] %v1663_v31 }

</bundles_post_ra>
